<compile_context>
chip_gen: v5e
topology: v5e:2x2
jax: 0.10.0
libtpu: 0.0.40
codegen_flags: <defaults>
</compile_context>

<pallas_src>
import functools
import math

import jax
import jax.numpy as jnp
from jax import lax
from jax.experimental import pallas as pl
from jax.experimental.pallas import tpu as pltpu


# ------------------------------ utilities ------------------------------

_vmem_limit_cache = None


def _vmem_limit_bytes():
    """Generation-aware scoped-VMEM limit (48 MiB on 64-MiB parts, 96 MiB on 128-MiB)."""
    global _vmem_limit_cache
    if _vmem_limit_cache is None:
        try:
            cap = int(pltpu.get_tpu_info().vmem_capacity_bytes)
            _vmem_limit_cache = min((cap * 3) // 4, 96 * 1024 * 1024)
        except Exception:
            _vmem_limit_cache = 48 * 1024 * 1024
    return _vmem_limit_cache


def _pick_tile(n, candidates):
    """Largest candidate tile that evenly divides n, else the full extent."""
    for c in candidates:
        if n % c == 0:
            return c
    return n


def _pick_head_group(num_heads, d_head):
    """Smallest head group whose lane width is a multiple of 128 (dense stores);
    fall back to all heads (full last dim always satisfies the layout rule)."""
    for g in range(1, num_heads + 1):
        if num_heads % g == 0 and (g * d_head) % 128 == 0:
            return g
    return num_heads


# --------------------------- Linear: x @ W + b ---------------------------

def _linear_kernel(x_ref, w_ref, b_ref, o_ref, *, scale):
    acc = jnp.dot(x_ref[...], w_ref[...], preferred_element_type=jnp.float32)
    acc = acc + b_ref[...]
    if scale != 1.0:
        # Epilogue scale: used to fold 1/sqrt(d_head) into the Q projection.
        acc = acc * scale
    o_ref[...] = acc.astype(o_ref.dtype)


def linear(x, w, b, *, scale=1.0):
    """x: (..., K), w: (K, N), b: (N,) -> scale * (x @ w + b)."""
    orig_shape = x.shape
    K = orig_shape[-1]
    N = w.shape[1]
    x2 = x.reshape(-1, K)
    M = x2.shape[0]
    tm = _pick_tile(M, (512, 256, 128, 64, 32, 16, 8))
    tn = _pick_tile(N, (512, 256, 128))  # weight streamed along N, not held whole
    b2 = b.reshape(1, N)

    out = pl.pallas_call(
        functools.partial(_linear_kernel, scale=scale),
        out_shape=jax.ShapeDtypeStruct((M, N), x.dtype),
        grid_spec=pltpu.PrefetchScalarGridSpec(
            num_scalar_prefetch=0,
            grid=(M // tm, N // tn),
            in_specs=[
                pl.BlockSpec((tm, K), lambda i, j: (i, 0)),
                pl.BlockSpec((K, tn), lambda i, j: (0, j)),
                pl.BlockSpec((1, tn), lambda i, j: (0, j)),
            ],
            out_specs=pl.BlockSpec((tm, tn), lambda i, j: (i, j)),
        ),
        compiler_params=pltpu.CompilerParams(
            dimension_semantics=("parallel", "parallel"),
            vmem_limit_bytes=_vmem_limit_bytes(),
        ),
    )(x2, w, b2)
    return out.reshape(*orig_shape[:-1], N)


# ---------------- Multi-head attention (flash, head-grouped) ----------------

def _mha_flash_kernel(q_ref, k_ref, v_ref, o_ref, m_sc, l_sc, acc_sc,
                      *, heads_per_block, d_head):
    # Blocks: q (1, tq, Hg*dh), k/v (1, tk, Hg*dh), o (1, tq, Hg*dh).
    # Grid axes: (batch, head_group, lq_tile, lk_tile); lk is the reduction axis.
    j = pl.program_id(3)

    @pl.when(j == 0)
    def _():
        m_sc[...] = jnp.full(m_sc.shape, -jnp.inf, m_sc.dtype)
        l_sc[...] = jnp.zeros(l_sc.shape, l_sc.dtype)
        acc_sc[...] = jnp.zeros(acc_sc.shape, acc_sc.dtype)

    for h in range(heads_per_block):           # static unroll over the head group
        lo, hi = h * d_head, (h + 1) * d_head
        q = q_ref[0, :, lo:hi]                 # (tq, dh); 1/sqrt(dh) already folded in
        k = k_ref[0, :, lo:hi]                 # (tk, dh)
        v = v_ref[0, :, lo:hi]                 # (tk, dh)

        # scores = Q K^T without a materialized transpose.
        s = lax.dot_general(
            q, k,
            dimension_numbers=(((1,), (1,)), ((), ())),
            preferred_element_type=jnp.float32,
        )                                       # (tq, tk), f32

        m_prev = m_sc[h]                        # (tq, 1)
        m_new = jnp.maximum(m_prev, jnp.max(s, axis=-1, keepdims=True))
        alpha = jnp.exp(m_prev - m_new)
        p = jnp.exp(s - m_new)
        l_sc[h] = alpha * l_sc[h] + jnp.sum(p, axis=-1, keepdims=True)
        # Deferred normalization: accumulate un-normalized attn @ V in f32.
        # Dropout(0.2) is identity in eval mode (TODO above for training).
        acc_sc[h] = alpha * acc_sc[h] + jnp.dot(
            p.astype(v.dtype), v, preferred_element_type=jnp.float32)
        m_sc[h] = m_new

    @pl.when(j == pl.num_programs(3) - 1)
    def _():
        for h in range(heads_per_block):
            lo, hi = h * d_head, (h + 1) * d_head
            # Exact divide (the approximate EUP reciprocal failed the tolerance).
            o_ref[0, :, lo:hi] = (acc_sc[h] / l_sc[h]).astype(o_ref.dtype)


def attention(q, k, v, num_heads):
    """q: (B, Lq, E), k/v: (B, Lk, E) with heads laid out contiguously along E.

    Returns (B, Lq, E) = concat_h softmax(Q_h K_h^T) V_h  (scale already in Q).
    Head split/merge is done purely via BlockSpec column indexing — no
    transposes and no HBM round trips for the per-head layout.
    """
    B, Lq, E = q.shape
    _, Lk, _ = k.shape
    assert E % num_heads == 0
    d_head = E // num_heads
    hg = _pick_head_group(num_heads, d_head)
    n_groups = num_heads // hg

    tq = _pick_tile(Lq, (256, 128, 64, 32, 16, 8))   # capped at 256 (v7x VMEM)
    tk = _pick_tile(Lk, (512, 256, 128, 64, 32, 16, 8))
    lane_w = hg * d_head

    kernel = functools.partial(
        _mha_flash_kernel, heads_per_block=hg, d_head=d_head)

    return pl.pallas_call(
        kernel,
        out_shape=jax.ShapeDtypeStruct((B, Lq, E), q.dtype),
        grid_spec=pltpu.PrefetchScalarGridSpec(
            num_scalar_prefetch=0,
            # Batch/head-group axes lead (megacore shards over heads, keeping
            # K/V residency per core); Lk reduction axis is last + "arbitrary".
            grid=(B, n_groups, Lq // tq, Lk // tk),
            in_specs=[
                pl.BlockSpec((1, tq, lane_w), lambda b, g, i, j: (b, i, g)),
                pl.BlockSpec((1, tk, lane_w), lambda b, g, i, j: (b, j, g)),
                pl.BlockSpec((1, tk, lane_w), lambda b, g, i, j: (b, j, g)),
            ],
            out_specs=pl.BlockSpec((1, tq, lane_w), lambda b, g, i, j: (b, i, g)),
            scratch_shapes=[
                pltpu.VMEM((hg, tq, 1), jnp.float32),       # running max
                pltpu.VMEM((hg, tq, 1), jnp.float32),       # running denom
                pltpu.VMEM((hg, tq, d_head), jnp.float32),  # output accumulator
            ],
        ),
        compiler_params=pltpu.CompilerParams(
            dimension_semantics=("parallel", "parallel", "parallel", "arbitrary"),
            vmem_limit_bytes=_vmem_limit_bytes(),
        ),
    )(q, k, v)


# ------------------------- MultiHeadSelfAttention -------------------------

def multi_head_self_attention(params, queries, keys, values, num_heads):
    E = params["w_q"].shape[1]
    d_head = E // num_heads
    inv_sqrt_d = 1.0 / math.sqrt(d_head)

    # 1/sqrt(d_head) folded into the Q projection's in-kernel epilogue.
    q = linear(queries, params["w_q"], params["b_q"], scale=inv_sqrt_d)
    k = linear(keys, params["w_k"], params["b_k"])
    v = linear(values, params["w_v"], params["b_v"])

    # Head split/merge handled entirely inside attention() via BlockSpecs.
    out = attention(q, k, v, num_heads)
    return linear(out, params["w_o"], params["b_o"])


# ------------------------------- Reference -------------------------------

def _reference(params, queries, keys, values, num_heads):
    def lin(x, w, b):
        return x @ w + b

    def t1(x):
        B, L, E = x.shape
        x = x.reshape(B, L, num_heads, E // num_heads).transpose(0, 2, 1, 3)
        return x.reshape(B * num_heads, L, E // num_heads)

    def t2(x):
        BH, L, dh = x.shape
        B = BH // num_heads
        x = x.reshape(B, num_heads, L, dh).transpose(0, 2, 1, 3)
        return x.reshape(B, L, num_heads * dh)

    q = t1(lin(queries, params["w_q"], params["b_q"]))
    k = t1(lin(keys, params["w_k"], params["b_k"]))
    v = t1(lin(values, params["w_v"], params["b_v"]))
    d = q.shape[-1]
    scores = jnp.einsum("bqd,bkd->bqk", q, k) / math.sqrt(d)
    attn = jax.nn.softmax(scores, axis=-1)
    out = t2(jnp.einsum("bqk,bkv->bqv", attn, v))
    return lin(out, params["w_o"], params["b_o"])


if __name__ == "__main__":
    B, L, E, H = 2, 8, 32, 4
    key = jax.random.PRNGKey(0)
    ks = jax.random.split(key, 11)
    wscale = 1.0 / math.sqrt(E)

    params = {
        "w_q": jax.random.normal(ks[0], (E, E), jnp.float32) * wscale,
        "b_q": jax.random.normal(ks[1], (E,), jnp.float32) * 0.1,
        "w_k": jax.random.normal(ks[2], (E, E), jnp.float32) * wscale,
        "b_k": jax.random.normal(ks[3], (E,), jnp.float32) * 0.1,
        "w_v": jax.random.normal(ks[4], (E, E), jnp.float32) * wscale,
        "b_v": jax.random.normal(ks[5], (E,), jnp.float32) * 0.1,
        "w_o": jax.random.normal(ks[6], (E, E), jnp.float32) * wscale,
        "b_o": jax.random.normal(ks[7], (E,), jnp.float32) * 0.1,
    }
    queries = jax.random.normal(ks[8], (B, L, E), jnp.float32)
    keys_in = jax.random.normal(ks[9], (B, L, E), jnp.float32)
    values = jax.random.normal(ks[10], (B, L, E), jnp.float32)

    out = multi_head_self_attention(params, queries, keys_in, values, H)
    out = jax.block_until_ready(out)

    ref = _reference(params, queries, keys_in, values, H)
    assert out.shape == (B, L, E), out.shape
    assert jnp.allclose(out, ref, atol=2e-3, rtol=2e-3), (
        float(jnp.max(jnp.abs(out - ref))))

    print("KERNEL_OK")
</pallas_src>

<mosaic_0001>
module attributes {stable_mosaic.version = 11 : i64} {
  func.func @_linear_kernel(%arg0: i32, %arg1: i32, %arg2: memref<16x32xf32, #tpu.memory_space<vmem>>, %arg3: memref<32x32xf32, #tpu.memory_space<vmem>>, %arg4: memref<1x32xf32, #tpu.memory_space<vmem>>, %arg5: memref<16x32xf32, #tpu.memory_space<vmem>>) attributes {dimension_semantics = [#tpu.dimension_semantics<parallel>, #tpu.dimension_semantics<parallel>], iteration_bounds = array<i64: 1, 1>, scalar_prefetch = 0 : i64, scratch_operands = 0 : i64, tpu.core_type = #tpu.core_type<tc>, window_params = [{transform_indices = @transform_0, window_bounds = array<i64: 16, 32>}, {transform_indices = @transform_1, window_bounds = array<i64: 32, 32>}, {transform_indices = @transform_2, window_bounds = array<i64: 1, 32>}, {transform_indices = @transform_3, window_bounds = array<i64: 16, 32>}]} {
    %c0 = arith.constant 0 : index
    %c0_0 = arith.constant 0 : index
    %0 = vector.load %arg2[%c0, %c0_0] : memref<16x32xf32, #tpu.memory_space<vmem>>, vector<16x32xf32>
    %c0_1 = arith.constant 0 : index
    %c0_2 = arith.constant 0 : index
    %1 = vector.load %arg3[%c0_1, %c0_2] : memref<32x32xf32, #tpu.memory_space<vmem>>, vector<32x32xf32>
    %cst = arith.constant dense<0.000000e+00> : vector<16x32xf32>
    %2 = tpu.matmul %0, %1, %cst {dimension_numbers = #tpu.dot_dimension_numbers<[1], [0], [0], [1], [0, 0, 1, 1], [], []>} : vector<16x32xf32>, vector<32x32xf32>, vector<16x32xf32> -> vector<16x32xf32>
    %c0_3 = arith.constant 0 : index
    %c0_4 = arith.constant 0 : index
    %3 = vector.load %arg4[%c0_3, %c0_4] : memref<1x32xf32, #tpu.memory_space<vmem>>, vector<1x32xf32>
    %4 = vector.broadcast %3 : vector<1x32xf32> to vector<16x32xf32>
    %5 = arith.addf %2, %4 : vector<16x32xf32>
    %cst_5 = arith.constant 0.353553385 : f32
    %6 = vector.broadcast %cst_5 : f32 to vector<16x32xf32>
    %7 = arith.mulf %5, %6 : vector<16x32xf32>
    %c0_6 = arith.constant 0 : index
    %c0_7 = arith.constant 0 : index
    %8 = vector.load %arg5[%c0_6, %c0_7] : memref<16x32xf32, #tpu.memory_space<vmem>>, vector<16x32xf32>
    tpu.vector_store %arg5[%c0_6, %c0_7], %7 {strides = array<i32>} : memref<16x32xf32, #tpu.memory_space<vmem>>, vector<16x32xf32>,
    return
  }
  func.func @transform_0(%arg0: i32, %arg1: i32) -> (i32, i32) {
    %c0_i32 = arith.constant 0 : i32
    %c0_i32_0 = arith.constant 0 : i32
    return %arg0, %c0_i32 : i32, i32
  }
  func.func @transform_1(%arg0: i32, %arg1: i32) -> (i32, i32) {
    %c0_i32 = arith.constant 0 : i32
    %c0_i32_0 = arith.constant 0 : i32
    return %c0_i32, %arg1 : i32, i32
  }
  func.func @transform_2(%arg0: i32, %arg1: i32) -> (i32, i32) {
    %c0_i32 = arith.constant 0 : i32
    %c0_i32_0 = arith.constant 0 : i32
    return %c0_i32, %arg1 : i32, i32
  }
  func.func @transform_3(%arg0: i32, %arg1: i32) -> (i32, i32) {
    %c0_i32 = arith.constant 0 : i32
    return %arg0, %arg1 : i32, i32
  }
}

</mosaic_0001>

<bundles_post_ra>
// kernel: tpu_custom_call.1
= control target key start
LH: loop header
LB: loop body
LE: loop exit
PB: predicated region body
PF: predicated region fallthrough
CT: control target
= control target key end

     0   :  { %8 = vsyncpa [#allocation3], 0  ;;  %s251_s0 = inlined_call_operand.hbm [shape: f32[16,32], index: 0, kind: input, shape index: {}]   ;;  %s252_s1 = inlined_call_operand.hbm [shape: f32[32,32], index: 1, kind: input, shape index: {}]   ;;  %s253_s2 = inlined_call_operand.vmem [shape: f32[1,32], index: 2, kind: input, shape index: {}]   ;;  %s254_s3 = inlined_call_operand.hbm [shape: f32[16,32], index: 3, kind: output, shape index: {}]  }
   0x1   :  { %9 = vsyncpa [#allocation6], 0 }
   0x2   :  { %10 = vsyncpa [#allocation4], 0  ;;  %s15_s14 = sshll.u32 %s251_s0, 4  ;;  %s201_s15 = smov [#allocation2]   ;;  %s16_s14 = int_to_ptr.hbm [resolvable:$true] %s15_s14 }
   0x3   :  { %s17_s16 = sshll.u32 %s201_s15, 4  ;;  %s28_s19 = sshll.u32 %s252_s1, 4  ;;  %s18_s16 = int_to_ptr.vmem [resolvable:$true] %s17_s16  ;;  %s29_s19 = int_to_ptr.hbm [resolvable:$true] %s28_s19 }
   0x4   :  { %s202_s20 = smov 128   ;;  %s203_s21 = smov 8  }
   0x5   :  { %23 = dma.hbm_to_vmem [thread:$0]  %s16_s14, 256, %s18_s16, [#allocation3], %s202_s20, %s202_s20, %s203_s21  }
   0x6   :  { %s204_s22 = smov [#allocation5]  }
   0x7   :  { %s30_s23 = sshll.u32 %s204_s22, 4  ;;  %s31_s23 = int_to_ptr.vmem [resolvable:$true] %s30_s23 }
   0x8   :  { %36 = dma.hbm_to_vmem [thread:$0]  %s29_s19, 512, %s31_s23, [#allocation6], %s202_s20, %s202_s20, %s203_s21  }
   0x9   :  { %195 = dma.done.wait [#allocation3], 256  }
   0xa   :  { %196 = vsyncadd [#allocation3], 4294967040 }
   0xb   :  { %197 = dma.done.wait [#allocation6], 512  }
   0xc   :  { %198 = vsyncadd [#allocation6], 4294966784  ;;  %v52_v0 = vld [vmem:[#allocation5 + $0x18] sm:$0xff]  ;;  %v51_v1 = vld [vmem:[#allocation5 + $0x10] sm:$0xff]  ;;  %vm57_vm0 = vcmask 261120   ;;  %s205_s24 = smov [#allocation7]  }
   0xd   :  { %76 = vmatpush.msra.mxu0 %v52_v0  ;;  %113 = vmatpush.msra.mxu1 %v52_v0  ;;  %v50_v2 = vld [vmem:[#allocation5 + $0x8] sm:$0xff]  ;;  %v49_v3 = vld [vmem:[#allocation5] sm:$0xff]  ;;  %v47_v4 = vld [vmem:[#allocation2] sm:$0xff]  ;;  %s95_s25 = sshll.u32 %s205_s24, 4  ;;  %s97_s28 = sshll.u32 %s254_s3, 4  ;;  %s96_s25 = int_to_ptr.vmem [resolvable:$true] %s95_s25  ;;  %s98_s28 = int_to_ptr.hbm [resolvable:$true] %s97_s28 }
   0xe   :  { %v48_v5 = vld [vmem:[#allocation2 + $0x8] sm:$0xff]  ;;  %v122_v6 = vld [vmem:[%s253_s2] ss:$0 sm:$0xff] }
   0xf   :  { %77 = vmatpush.msra.mxu0 %v51_v1  ;;  %114 = vmatpush.msra.mxu1 %v51_v1 }
  0x11   :  { %78 = vmatpush.msra.mxu0 %v50_v2  ;;  %115 = vmatpush.msra.mxu1 %v50_v2 }
  0x13   :  { %79 = vmatpush.msra.mxu0 %v49_v3  ;;  %116 = vmatpush.msra.mxu1 %v49_v3 }
  0x14   :  { %111 = vmatmul.msk.f32.vlgmr.msra.gmra.mxu0 %vm57_vm0, %v47_v4  ;;  %112 = vmatmul.msk.f32.vlgmr.msra.gmra.mxu1 %vm57_vm0, %v48_v5 }
  0x91   :  { %v81_v7 = vpop.f32.mrf.mxu0  ;;  %v84_v8 = vpop.f32.mrf.mxu1 }
  0x92   :  { %v82_v9 = vadd.f32 %v122_v6, %v81_v7  ;;  %v85_v10 = vadd.f32 %v122_v6, %v84_v8 }
  0x94   :  { %v87_v11 = vmul.f32 0.35355338, %v82_v9  ;;  %v88_v12 = vmul.f32 0.35355338, %v85_v10 }
  0x96   :  { %89 = vst.msk [vmem:[#allocation7] sm:$0xff] %vm57_vm0, %v87_v11 }
  0x97   :  { %90 = vst.msk [vmem:[#allocation7 + $0x8] sm:$0xff] %vm57_vm0, %v88_v12 }
  0x98   :  { %103 = dma.vmem_to_hbm [thread:$0]  %s96_s25, 256, %s98_s28, [#allocation4], %s202_s20, %s202_s20, %s203_s21  }
  0x99   :  { %199 = dma.done.wait [#allocation4], 256  }
  0x9a   :  { %200 = vsyncadd [#allocation4], 4294967040 }
  0x9b   :  { %108 = vsyncpa [#allocation3], 1 }
  0x9c   :  { %109 = vsyncpa [#allocation6], 1 }
  0x9d   :  { %110 = vsyncpa [#allocation4], 1 }

</bundles_post_ra>
